<compile_context>
chip_gen: v5e
topology: v5e:2x2
jax: 0.10.0
libtpu: 0.0.40
codegen_flags: <defaults>
</compile_context>

<pallas_src>
import jax
import jax.numpy as jnp
import numpy as np
from jax.experimental import pallas as pl
from jax.experimental.pallas import tpu as pltpu

LANE = 128


# ------------------------------ kernel factory -------------------------------

def make_decoder_kernel(layer_meta, proj_meta, *, num_layers, kernel_size,
                        dilation_base, block_batch, seq_len, out_lanes):
    K = kernel_size
    Bt = block_batch
    T = seq_len
    N = Bt * T

    def kernel(z_ref, c_ref, w_ref, b_ref, out_ref):
        w_all = w_ref[...]                       # (Rw, 128) bf16 — packed weights
        b_all = b_ref[...]                       # (Rb, 128) f32  — packed biases

        # Batch-packed, flattened (Bt*T, C) channels-last activations (f32).
        x = jnp.concatenate([z_ref[...], c_ref[...]],
                            axis=-1).astype(jnp.float32).reshape(N, -1)

        # Hoisted ONCE per block: time index within each packed batch element.
        # After flattening, rolling rows by s pulls row (b*T + t - s); the rows
        # with t < s (exactly the ones whose source crossed a batch boundary)
        # are masked to zero, which is precisely the causal left zero-padding.
        t_idx = jax.lax.broadcasted_iota(jnp.int32, (N, 1), 0) % T

        def weight(meta):
            off, rows, cout, _ = meta
            return w_all[off:off + rows, :cout]

        def bias(meta):
            _, _, cout, brow = meta
            return b_all[brow:brow + 1, :cout]

        def causal_conv(x2, meta, d, masks):
            # im2col: K dilated causal taps concatenated along lanes -> one dot.
            cols = []
            for k in range(K):
                s = (K - 1 - k) * d
                if s == 0:
                    cols.append(x2)
                else:
                    cols.append(jnp.where(masks[k],
                                          pltpu.roll(x2, shift=s, axis=0), 0.0))
            col = jnp.concatenate(cols, axis=-1).astype(jnp.bfloat16)  # (N, K*Cin)
            y = jnp.dot(col, weight(meta), preferred_element_type=jnp.float32)
            return y + bias(meta)                                      # bias once, after the dot

        for layer in range(num_layers):
            m = layer_meta[layer]
            d = dilation_base ** layer
            # per-layer masks shared by conv1/conv2 (same shift set)
            masks = [t_idx >= (K - 1 - k) * d for k in range(K)]
            y = jnp.maximum(causal_conv(x, m['conv1'], d, masks), 0.0)  # ReLU (dropout p=0)
            y = causal_conv(y, m['conv2'], d, masks)
            if layer < num_layers - 1:                                  # last block: no ReLU after conv2
                y = jnp.maximum(y, 0.0)
            if m['conv3'] is not None:                                  # 1x1 residual conv
                res = jnp.dot(x.astype(jnp.bfloat16), weight(m['conv3']),
                              preferred_element_type=jnp.float32) + bias(m['conv3'])
            else:
                res = x
            x = y + res

        # Final projection, zero-padded to 128 output lanes -> lane-dense store.
        out = jnp.dot(x.astype(jnp.bfloat16), weight(proj_meta),
                      preferred_element_type=jnp.float32) + bias(proj_meta)
        out_ref[...] = out.reshape(Bt, T, out_lanes).astype(out_ref.dtype)

    return kernel


# ---------------------------- parameter packing -------------------------------

def _pack_params(flat_weights, has_conv3, num_layers, kernel_size, target_dim,
                 lane=LANE, align=16):
    """Pack all conv/linear weights (im2col-reshaped, bf16) into one (R, 128)
    slab and all biases (f32) into one (Rb, 128) slab.  Returns slabs + static
    metadata (row_offset, rows, valid_cols, bias_row) per weight."""
    w_pieces, b_pieces = [], []
    cur = 0

    def add_w(w2d):
        nonlocal cur
        rows, cout = w2d.shape
        pad = (-cur) % align                    # keep each block sublane-aligned
        if pad:
            w_pieces.append(jnp.zeros((pad, lane), jnp.float32))
            cur += pad
        off = cur
        w_pieces.append(jnp.pad(w2d.astype(jnp.float32),
                                ((0, 0), (0, lane - cout))))
        cur += rows
        return (off, rows, cout)

    def add_b(b):
        cout = b.shape[-1]
        row = len(b_pieces)
        b_pieces.append(jnp.pad(b.reshape(1, cout).astype(jnp.float32),
                                ((0, 0), (0, lane - cout))))
        return row

    layer_meta = []
    i = 0
    for layer in range(num_layers):
        w1, b1, w2, b2 = flat_weights[i:i + 4]
        i += 4
        K, cin, cout = w1.shape
        m1 = add_w(w1.reshape(K * cin, cout)) + (add_b(b1),)
        K2, cin2, cout2 = w2.shape
        m2 = add_w(w2.reshape(K2 * cin2, cout2)) + (add_b(b2),)
        m3 = None
        if has_conv3[layer]:
            w3, b3 = flat_weights[i:i + 2]
            i += 2
            m3 = add_w(w3) + (add_b(b3),)
        layer_meta.append(dict(conv1=m1, conv2=m2, conv3=m3))

    wp, bp = flat_weights[i], flat_weights[i + 1]
    # zero-pad the projection to a full 128-lane output (lane-dense store)
    wp_pad = jnp.pad(wp.astype(jnp.float32), ((0, 0), (0, lane - wp.shape[1])))
    bp_pad = jnp.pad(bp.reshape(1, -1).astype(jnp.float32),
                     ((0, 0), (0, lane - bp.shape[-1])))
    proj_meta = add_w(wp_pad) + (add_b(bp_pad),)

    w_slab = jnp.concatenate(w_pieces, axis=0)
    pad = (-w_slab.shape[0]) % 8
    if pad:
        w_slab = jnp.pad(w_slab, ((0, pad), (0, 0)))
    b_slab = jnp.concatenate(b_pieces, axis=0)
    pad = (-b_slab.shape[0]) % 8
    if pad:
        b_slab = jnp.pad(b_slab, ((0, pad), (0, 0)))
    return w_slab.astype(jnp.bfloat16), b_slab, layer_meta, proj_meta


# --------------------------------- wrapper ------------------------------------

def tcn_decoder_forward(z, cond, flat_weights, *, has_conv3, num_layers,
                        kernel_size, dilation_base, target_dim, block_batch=None):
    B, T, Lz = z.shape
    Lc = cond.shape[-1]
    z = z.astype(jnp.float32)
    cond = cond.astype(jnp.float32)

    w_slab, b_slab, layer_meta, proj_meta = _pack_params(
        flat_weights, has_conv3, num_layers, kernel_size, target_dim)

    # Batch-pack: largest divisor of B with <= ~2k packed rows per block.
    if block_batch is None:
        block_batch = 1
        for d in range(1, B + 1):
            if B % d == 0 and d * T <= 2048:
                block_batch = d
    assert B % block_batch == 0, "block_batch must divide the batch size"
    Bt = block_batch

    kernel = make_decoder_kernel(
        layer_meta, proj_meta, num_layers=num_layers, kernel_size=kernel_size,
        dilation_base=dilation_base, block_batch=Bt, seq_len=T, out_lanes=LANE)

    in_specs = [
        pl.BlockSpec((Bt, T, Lz), lambda b: (b, 0, 0)),          # z
        pl.BlockSpec((Bt, T, Lc), lambda b: (b, 0, 0)),          # cond
        pl.BlockSpec(w_slab.shape, lambda b: (0, 0)),            # packed weights (bf16)
        pl.BlockSpec(b_slab.shape, lambda b: (0, 0)),            # packed biases (f32)
    ]
    out_spec = pl.BlockSpec((Bt, T, LANE), lambda b: (b, 0, 0))  # lane-dense slab

    out_padded = pl.pallas_call(
        kernel,
        out_shape=jax.ShapeDtypeStruct((B, T, LANE), jnp.float32),
        grid=(B // Bt,),
        in_specs=in_specs,
        out_specs=out_spec,
        compiler_params=pltpu.CompilerParams(dimension_semantics=("parallel",)),
    )(z, cond, w_slab, b_slab)

    return out_padded[..., :target_dim]


# ----------------------------- pure-JAX reference ------------------------------

def _ref_causal_conv(x, w, b, dilation):
    K = w.shape[0]
    B, T, _ = x.shape
    acc = jnp.zeros((B, T, w.shape[2]), jnp.float32) + b
    for k in range(K):
        s = (K - 1 - k) * dilation
        xs = jnp.pad(x, ((0, 0), (s, 0), (0, 0)))[:, :T, :]
        acc = acc + jnp.einsum('btc,cd->btd', xs, w[k],
                               precision=jax.lax.Precision.HIGHEST)
    return acc


def ref_forward(z, cond, flat_weights, *, has_conv3, num_layers,
                kernel_size, dilation_base):
    x = jnp.concatenate([z, cond], axis=-1).astype(jnp.float32)
    i = 0
    for layer in range(num_layers):
        w1, b1, w2, b2 = flat_weights[i:i + 4]
        i += 4
        if has_conv3[layer]:
            w3, b3 = flat_weights[i:i + 2]
            i += 2
        d = dilation_base ** layer
        residual = x
        y = jax.nn.relu(_ref_causal_conv(x, w1, b1, d))
        y = _ref_causal_conv(y, w2, b2, d)
        if layer < num_layers - 1:
            y = jax.nn.relu(y)
        if has_conv3[layer]:
            residual = jnp.einsum('btc,cd->btd', residual, w3,
                                  precision=jax.lax.Precision.HIGHEST) + b3
        x = y + residual
    wp, bp = flat_weights[i], flat_weights[i + 1]
    return jnp.einsum('bth,hd->btd', x, wp,
                      precision=jax.lax.Precision.HIGHEST) + bp


# ----------------------------------- main --------------------------------------

if __name__ == "__main__":
    # Small, module-consistent sizes.
    B, T = 4, 16
    latent_dim, condition_dim = 6, 4
    hidden_dim, target_dim = 16, 5
    kernel_size, num_layers, dilation_base = 3, 2, 2
    Din = latent_dim + condition_dim

    key = jax.random.PRNGKey(0)

    def draw(key, shape, scale=0.1):
        key, sub = jax.random.split(key)
        return key, (scale * jax.random.normal(sub, shape, jnp.float32))

    # Deterministic synthetic parameters (PyTorch shapes noted; stored
    # pre-transposed for channels-last matmul: Conv1d (Cout, Cin, K) ->
    # (K, Cin, Cout), Linear (out, in) -> (in, out), biases -> (1, C)).
    flat_weights = []
    has_conv3 = []
    for layer in range(num_layers):
        in_ch = Din if layer == 0 else hidden_dim
        out_ch = hidden_dim                     # target_size == num_filters == hidden_dim
        key, w1 = draw(key, (kernel_size, in_ch, hidden_dim))
        key, b1 = draw(key, (1, hidden_dim))
        key, w2 = draw(key, (kernel_size, hidden_dim, out_ch))
        key, b2 = draw(key, (1, out_ch))
        flat_weights += [w1, b1, w2, b2]
        if in_ch != out_ch:
            key, w3 = draw(key, (in_ch, out_ch))
            key, b3 = draw(key, (1, out_ch))
            flat_weights += [w3, b3]
            has_conv3.append(True)
        else:
            has_conv3.append(False)
    key, wp = draw(key, (hidden_dim, target_dim))
    key, bp = draw(key, (1, target_dim))
    flat_weights += [wp, bp]

    # Inputs.
    key, z = draw(key, (B, T, latent_dim), scale=1.0)
    key, cond = draw(key, (B, T, condition_dim), scale=1.0)

    out = tcn_decoder_forward(
        z, cond, flat_weights,
        has_conv3=has_conv3, num_layers=num_layers,
        kernel_size=kernel_size, dilation_base=dilation_base,
        target_dim=target_dim, block_batch=2)    # 2 batch elems / block, grid=(2,)
    out = jax.block_until_ready(out)

    ref = ref_forward(
        z, cond, flat_weights,
        has_conv3=has_conv3, num_layers=num_layers,
        kernel_size=kernel_size, dilation_base=dilation_base)
    ref = jax.block_until_ready(ref)

    assert out.shape == (B, T, target_dim)
    # bf16 MXU inputs (f32 accumulate) vs f32-HIGHEST reference -> loosened tol.
    np.testing.assert_allclose(np.asarray(out), np.asarray(ref),
                               rtol=2e-2, atol=2e-2)
    print("KERNEL_OK")
</pallas_src>

<mosaic_0001>
module attributes {stable_mosaic.version = 11 : i64} {
  func.func @kernel(%arg0: i32, %arg1: memref<2x16x6xf32, #tpu.memory_space<vmem>>, %arg2: memref<2x16x4xf32, #tpu.memory_space<vmem>>, %arg3: memref<208x128xbf16, #tpu.memory_space<vmem>>, %arg4: memref<8x128xf32, #tpu.memory_space<vmem>>, %arg5: memref<2x16x128xf32, #tpu.memory_space<vmem>>) attributes {dimension_semantics = [#tpu.dimension_semantics<parallel>], iteration_bounds = array<i64: 2>, scalar_prefetch = 0 : i64, scratch_operands = 0 : i64, tpu.core_type = #tpu.core_type<tc>, window_params = [{transform_indices = @transform_0, window_bounds = array<i64: 2, 16, 6>}, {transform_indices = @transform_1, window_bounds = array<i64: 2, 16, 4>}, {pipeline_mode = #tpu.pipeline_mode<synchronous>, transform_indices = @transform_2, window_bounds = array<i64: 208, 128>}, {pipeline_mode = #tpu.pipeline_mode<synchronous>, transform_indices = @transform_3, window_bounds = array<i64: 8, 128>}, {transform_indices = @transform_4, window_bounds = array<i64: 2, 16, 128>}]} {
    %c0 = arith.constant 0 : index
    %c0_0 = arith.constant 0 : index
    %0 = vector.load %arg3[%c0, %c0_0] : memref<208x128xbf16, #tpu.memory_space<vmem>>, vector<208x128xbf16>
    %c0_1 = arith.constant 0 : index
    %c0_2 = arith.constant 0 : index
    %1 = vector.load %arg4[%c0_1, %c0_2] : memref<8x128xf32, #tpu.memory_space<vmem>>, vector<8x128xf32>
    %c0_3 = arith.constant 0 : index
    %c0_4 = arith.constant 0 : index
    %c0_5 = arith.constant 0 : index
    %2 = vector.load %arg1[%c0_3, %c0_4, %c0_5] : memref<2x16x6xf32, #tpu.memory_space<vmem>>, vector<2x16x6xf32>
    %c0_6 = arith.constant 0 : index
    %c0_7 = arith.constant 0 : index
    %c0_8 = arith.constant 0 : index
    %3 = vector.load %arg2[%c0_6, %c0_7, %c0_8] : memref<2x16x4xf32, #tpu.memory_space<vmem>>, vector<2x16x4xf32>
    %4 = tpu.concatenate %2, %3 in 2 : vector<2x16x6xf32>, vector<2x16x4xf32> -> vector<2x16x10xf32>
    %5 = vector.shape_cast %4 : vector<2x16x10xf32> to vector<32x10xf32>
    %6 = tpu.iota {dimensions = array<i32: 0>} : vector<32x1xi32>
    %c16_i32 = arith.constant 16 : i32
    %c0_i32 = arith.constant 0 : i32
    %7 = arith.cmpi eq, %c16_i32, %c0_i32 : i32
    %c1_i32 = arith.constant 1 : i32
    %8 = arith.select %7, %c1_i32, %c16_i32 : i32
    %9 = vector.broadcast %8 : i32 to vector<32x1xi32>
    %10 = arith.remsi %6, %9 : vector<32x1xi32>
    %c0_i32_9 = arith.constant 0 : i32
    %11 = vector.broadcast %c0_i32_9 : i32 to vector<32x1xi32>
    %12 = arith.cmpi ne, %10, %11 : vector<32x1xi32>
    %c0_i32_10 = arith.constant 0 : i32
    %13 = vector.broadcast %c0_i32_10 : i32 to vector<32x1xi32>
    %14 = arith.cmpi slt, %10, %13 : vector<32x1xi32>
    %c0_i32_11 = arith.constant 0 : i32
    %15 = arith.cmpi slt, %8, %c0_i32_11 : i32
    %16 = vector.broadcast %15 : i1 to vector<32x1xi1>
    %17 = vector.broadcast %16 : vector<32x1xi1> to vector<32x1xi1>
    %18 = arith.xori %14, %17 : vector<32x1xi1>
    %19 = arith.andi %18, %12 : vector<32x1xi1>
    %20 = vector.broadcast %8 : i32 to vector<32x1xi32>
    %21 = arith.addi %10, %20 : vector<32x1xi32>
    %22 = arith.select %19, %21, %10 : vector<32x1xi1>, vector<32x1xi32>
    %c2_i32 = arith.constant 2 : i32
    %23 = vector.broadcast %c2_i32 : i32 to vector<32x1xi32>
    %24 = arith.cmpi sge, %22, %23 : vector<32x1xi32>
    %c1_i32_12 = arith.constant 1 : i32
    %25 = vector.broadcast %c1_i32_12 : i32 to vector<32x1xi32>
    %26 = arith.cmpi sge, %22, %25 : vector<32x1xi32>
    %c2_i32_13 = arith.constant 2 : i32
    %27 = tpu.dynamic_rotate %5 by %c2_i32_13 dim 0 : vector<32x10xf32>, i32 -> vector<32x10xf32>
    %cst = arith.constant 0.000000e+00 : f32
    %28 = vector.shape_cast %24 : vector<32x1xi1> to vector<32x1xi1>
    %29 = vector.broadcast %28 : vector<32x1xi1> to vector<32x10xi1>
    %30 = vector.broadcast %cst : f32 to vector<32x10xf32>
    %31 = arith.select %29, %27, %30 : vector<32x10xi1>, vector<32x10xf32>
    %c1_i32_14 = arith.constant 1 : i32
    %32 = tpu.dynamic_rotate %5 by %c1_i32_14 dim 0 : vector<32x10xf32>, i32 -> vector<32x10xf32>
    %cst_15 = arith.constant 0.000000e+00 : f32
    %33 = vector.shape_cast %26 : vector<32x1xi1> to vector<32x1xi1>
    %34 = vector.broadcast %33 : vector<32x1xi1> to vector<32x10xi1>
    %35 = vector.broadcast %cst_15 : f32 to vector<32x10xf32>
    %36 = arith.select %34, %32, %35 : vector<32x10xi1>, vector<32x10xf32>
    %37 = tpu.concatenate %31, %36, %5 in 1 : vector<32x10xf32>, vector<32x10xf32>, vector<32x10xf32> -> vector<32x30xf32>
    %38 = arith.truncf %37 : vector<32x30xf32> to vector<32x30xbf16>
    %39 = vector.extract_strided_slice %0 {offsets = [0, 0], sizes = [30, 16], strides = [1, 1]} : vector<208x128xbf16> to vector<30x16xbf16>
    %cst_16 = arith.constant dense<0.000000e+00> : vector<32x16xf32>
    %40 = tpu.matmul %38, %39, %cst_16 {dimension_numbers = #tpu.dot_dimension_numbers<[1], [0], [0], [1], [0, 0, 1, 1], [], []>} : vector<32x30xbf16>, vector<30x16xbf16>, vector<32x16xf32> -> vector<32x16xf32>
    %41 = vector.extract_strided_slice %1 {offsets = [0, 0], sizes = [1, 16], strides = [1, 1]} : vector<8x128xf32> to vector<1x16xf32>
    %42 = vector.broadcast %41 : vector<1x16xf32> to vector<32x16xf32>
    %43 = arith.addf %40, %42 : vector<32x16xf32>
    %cst_17 = arith.constant 0.000000e+00 : f32
    %44 = vector.broadcast %cst_17 : f32 to vector<32x16xf32>
    %45 = arith.maximumf %43, %44 : vector<32x16xf32>
    %c2_i32_18 = arith.constant 2 : i32
    %46 = tpu.dynamic_rotate %45 by %c2_i32_18 dim 0 : vector<32x16xf32>, i32 -> vector<32x16xf32>
    %cst_19 = arith.constant 0.000000e+00 : f32
    %47 = vector.shape_cast %24 : vector<32x1xi1> to vector<32x1xi1>
    %48 = vector.broadcast %47 : vector<32x1xi1> to vector<32x16xi1>
    %49 = vector.broadcast %cst_19 : f32 to vector<32x16xf32>
    %50 = arith.select %48, %46, %49 : vector<32x16xi1>, vector<32x16xf32>
    %c1_i32_20 = arith.constant 1 : i32
    %51 = tpu.dynamic_rotate %45 by %c1_i32_20 dim 0 : vector<32x16xf32>, i32 -> vector<32x16xf32>
    %cst_21 = arith.constant 0.000000e+00 : f32
    %52 = vector.shape_cast %26 : vector<32x1xi1> to vector<32x1xi1>
    %53 = vector.broadcast %52 : vector<32x1xi1> to vector<32x16xi1>
    %54 = vector.broadcast %cst_21 : f32 to vector<32x16xf32>
    %55 = arith.select %53, %51, %54 : vector<32x16xi1>, vector<32x16xf32>
    %56 = tpu.concatenate %50, %55, %45 in 1 : vector<32x16xf32>, vector<32x16xf32>, vector<32x16xf32> -> vector<32x48xf32>
    %57 = arith.truncf %56 : vector<32x48xf32> to vector<32x48xbf16>
    %58 = vector.extract_strided_slice %0 {offsets = [32, 0], sizes = [48, 16], strides = [1, 1]} : vector<208x128xbf16> to vector<48x16xbf16>
    %cst_22 = arith.constant dense<0.000000e+00> : vector<32x16xf32>
    %59 = tpu.matmul %57, %58, %cst_22 {dimension_numbers = #tpu.dot_dimension_numbers<[1], [0], [0], [1], [0, 0, 1, 1], [], []>} : vector<32x48xbf16>, vector<48x16xbf16>, vector<32x16xf32> -> vector<32x16xf32>
    %60 = vector.extract_strided_slice %1 {offsets = [1, 0], sizes = [1, 16], strides = [1, 1]} : vector<8x128xf32> to vector<1x16xf32>
    %61 = vector.broadcast %60 : vector<1x16xf32> to vector<32x16xf32>
    %62 = arith.addf %59, %61 : vector<32x16xf32>
    %cst_23 = arith.constant 0.000000e+00 : f32
    %63 = vector.broadcast %cst_23 : f32 to vector<32x16xf32>
    %64 = arith.maximumf %62, %63 : vector<32x16xf32>
    %65 = arith.truncf %5 : vector<32x10xf32> to vector<32x10xbf16>
    %66 = vector.extract_strided_slice %0 {offsets = [80, 0], sizes = [10, 16], strides = [1, 1]} : vector<208x128xbf16> to vector<10x16xbf16>
    %cst_24 = arith.constant dense<0.000000e+00> : vector<32x16xf32>
    %67 = tpu.matmul %65, %66, %cst_24 {dimension_numbers = #tpu.dot_dimension_numbers<[1], [0], [0], [1], [0, 0, 1, 1], [], []>} : vector<32x10xbf16>, vector<10x16xbf16>, vector<32x16xf32> -> vector<32x16xf32>
    %68 = vector.extract_strided_slice %1 {offsets = [2, 0], sizes = [1, 16], strides = [1, 1]} : vector<8x128xf32> to vector<1x16xf32>
    %69 = vector.broadcast %68 : vector<1x16xf32> to vector<32x16xf32>
    %70 = arith.addf %67, %69 : vector<32x16xf32>
    %71 = arith.addf %64, %70 : vector<32x16xf32>
    %c4_i32 = arith.constant 4 : i32
    %72 = vector.broadcast %c4_i32 : i32 to vector<32x1xi32>
    %73 = arith.cmpi sge, %22, %72 : vector<32x1xi32>
    %c2_i32_25 = arith.constant 2 : i32
    %74 = vector.broadcast %c2_i32_25 : i32 to vector<32x1xi32>
    %75 = arith.cmpi sge, %22, %74 : vector<32x1xi32>
    %c4_i32_26 = arith.constant 4 : i32
    %76 = tpu.dynamic_rotate %71 by %c4_i32_26 dim 0 : vector<32x16xf32>, i32 -> vector<32x16xf32>
    %cst_27 = arith.constant 0.000000e+00 : f32
    %77 = vector.shape_cast %73 : vector<32x1xi1> to vector<32x1xi1>
    %78 = vector.broadcast %77 : vector<32x1xi1> to vector<32x16xi1>
    %79 = vector.broadcast %cst_27 : f32 to vector<32x16xf32>
    %80 = arith.select %78, %76, %79 : vector<32x16xi1>, vector<32x16xf32>
    %c2_i32_28 = arith.constant 2 : i32
    %81 = tpu.dynamic_rotate %71 by %c2_i32_28 dim 0 : vector<32x16xf32>, i32 -> vector<32x16xf32>
    %cst_29 = arith.constant 0.000000e+00 : f32
    %82 = vector.shape_cast %75 : vector<32x1xi1> to vector<32x1xi1>
    %83 = vector.broadcast %82 : vector<32x1xi1> to vector<32x16xi1>
    %84 = vector.broadcast %cst_29 : f32 to vector<32x16xf32>
    %85 = arith.select %83, %81, %84 : vector<32x16xi1>, vector<32x16xf32>
    %86 = tpu.concatenate %80, %85, %71 in 1 : vector<32x16xf32>, vector<32x16xf32>, vector<32x16xf32> -> vector<32x48xf32>
    %87 = arith.truncf %86 : vector<32x48xf32> to vector<32x48xbf16>
    %88 = vector.extract_strided_slice %0 {offsets = [96, 0], sizes = [48, 16], strides = [1, 1]} : vector<208x128xbf16> to vector<48x16xbf16>
    %cst_30 = arith.constant dense<0.000000e+00> : vector<32x16xf32>
    %89 = tpu.matmul %87, %88, %cst_30 {dimension_numbers = #tpu.dot_dimension_numbers<[1], [0], [0], [1], [0, 0, 1, 1], [], []>} : vector<32x48xbf16>, vector<48x16xbf16>, vector<32x16xf32> -> vector<32x16xf32>
    %90 = vector.extract_strided_slice %1 {offsets = [3, 0], sizes = [1, 16], strides = [1, 1]} : vector<8x128xf32> to vector<1x16xf32>
    %91 = vector.broadcast %90 : vector<1x16xf32> to vector<32x16xf32>
    %92 = arith.addf %89, %91 : vector<32x16xf32>
    %cst_31 = arith.constant 0.000000e+00 : f32
    %93 = vector.broadcast %cst_31 : f32 to vector<32x16xf32>
    %94 = arith.maximumf %92, %93 : vector<32x16xf32>
    %c4_i32_32 = arith.constant 4 : i32
    %95 = tpu.dynamic_rotate %94 by %c4_i32_32 dim 0 : vector<32x16xf32>, i32 -> vector<32x16xf32>
    %cst_33 = arith.constant 0.000000e+00 : f32
    %96 = vector.shape_cast %73 : vector<32x1xi1> to vector<32x1xi1>
    %97 = vector.broadcast %96 : vector<32x1xi1> to vector<32x16xi1>
    %98 = vector.broadcast %cst_33 : f32 to vector<32x16xf32>
    %99 = arith.select %97, %95, %98 : vector<32x16xi1>, vector<32x16xf32>
    %c2_i32_34 = arith.constant 2 : i32
    %100 = tpu.dynamic_rotate %94 by %c2_i32_34 dim 0 : vector<32x16xf32>, i32 -> vector<32x16xf32>
    %cst_35 = arith.constant 0.000000e+00 : f32
    %101 = vector.shape_cast %75 : vector<32x1xi1> to vector<32x1xi1>
    %102 = vector.broadcast %101 : vector<32x1xi1> to vector<32x16xi1>
    %103 = vector.broadcast %cst_35 : f32 to vector<32x16xf32>
    %104 = arith.select %102, %100, %103 : vector<32x16xi1>, vector<32x16xf32>
    %105 = tpu.concatenate %99, %104, %94 in 1 : vector<32x16xf32>, vector<32x16xf32>, vector<32x16xf32> -> vector<32x48xf32>
    %106 = arith.truncf %105 : vector<32x48xf32> to vector<32x48xbf16>
    %107 = vector.extract_strided_slice %0 {offsets = [144, 0], sizes = [48, 16], strides = [1, 1]} : vector<208x128xbf16> to vector<48x16xbf16>
    %cst_36 = arith.constant dense<0.000000e+00> : vector<32x16xf32>
    %108 = tpu.matmul %106, %107, %cst_36 {dimension_numbers = #tpu.dot_dimension_numbers<[1], [0], [0], [1], [0, 0, 1, 1], [], []>} : vector<32x48xbf16>, vector<48x16xbf16>, vector<32x16xf32> -> vector<32x16xf32>
    %109 = vector.extract_strided_slice %1 {offsets = [4, 0], sizes = [1, 16], strides = [1, 1]} : vector<8x128xf32> to vector<1x16xf32>
    %110 = vector.broadcast %109 : vector<1x16xf32> to vector<32x16xf32>
    %111 = arith.addf %108, %110 : vector<32x16xf32>
    %112 = arith.addf %111, %71 : vector<32x16xf32>
    %113 = arith.truncf %112 : vector<32x16xf32> to vector<32x16xbf16>
    %114 = vector.extract_strided_slice %0 {offsets = [192, 0], sizes = [16, 128], strides = [1, 1]} : vector<208x128xbf16> to vector<16x128xbf16>
    %cst_37 = arith.constant dense<0.000000e+00> : vector<32x128xf32>
    %115 = tpu.matmul %113, %114, %cst_37 {dimension_numbers = #tpu.dot_dimension_numbers<[1], [0], [0], [1], [0, 0, 1, 1], [], []>} : vector<32x16xbf16>, vector<16x128xbf16>, vector<32x128xf32> -> vector<32x128xf32>
    %116 = vector.extract_strided_slice %1 {offsets = [5, 0], sizes = [1, 128], strides = [1, 1]} : vector<8x128xf32> to vector<1x128xf32>
    %117 = vector.broadcast %116 : vector<1x128xf32> to vector<32x128xf32>
    %118 = arith.addf %115, %117 : vector<32x128xf32>
    %119 = vector.shape_cast %118 : vector<32x128xf32> to vector<2x16x128xf32>
    %c0_38 = arith.constant 0 : index
    %c0_39 = arith.constant 0 : index
    %c0_40 = arith.constant 0 : index
    %120 = vector.load %arg5[%c0_38, %c0_39, %c0_40] : memref<2x16x128xf32, #tpu.memory_space<vmem>>, vector<2x16x128xf32>
    tpu.vector_store %arg5[%c0_38, %c0_39, %c0_40], %119 {strides = array<i32>} : memref<2x16x128xf32, #tpu.memory_space<vmem>>, vector<2x16x128xf32>,
    return
  }
  func.func @transform_0(%arg0: i32) -> (i32, i32, i32) {
    %c0_i32 = arith.constant 0 : i32
    %c0_i32_0 = arith.constant 0 : i32
    %c0_i32_1 = arith.constant 0 : i32
    return %arg0, %c0_i32, %c0_i32_0 : i32, i32, i32
  }
  func.func @transform_1(%arg0: i32) -> (i32, i32, i32) {
    %c0_i32 = arith.constant 0 : i32
    %c0_i32_0 = arith.constant 0 : i32
    %c0_i32_1 = arith.constant 0 : i32
    return %arg0, %c0_i32, %c0_i32_0 : i32, i32, i32
  }
  func.func @transform_2(%arg0: i32) -> (i32, i32) {
    %c0_i32 = arith.constant 0 : i32
    %c0_i32_0 = arith.constant 0 : i32
    %c0_i32_1 = arith.constant 0 : i32
    return %c0_i32, %c0_i32_0 : i32, i32
  }
  func.func @transform_3(%arg0: i32) -> (i32, i32) {
    %c0_i32 = arith.constant 0 : i32
    %c0_i32_0 = arith.constant 0 : i32
    %c0_i32_1 = arith.constant 0 : i32
    return %c0_i32, %c0_i32_0 : i32, i32
  }
  func.func @transform_4(%arg0: i32) -> (i32, i32, i32) {
    %c0_i32 = arith.constant 0 : i32
    %c0_i32_0 = arith.constant 0 : i32
    %c0_i32_1 = arith.constant 0 : i32
    return %arg0, %c0_i32, %c0_i32_0 : i32, i32, i32
  }
}

</mosaic_0001>

<bundles_post_ra>
// kernel: tpu_custom_call.1
= control target key start
LH: loop header
LB: loop body
LE: loop exit
PB: predicated region body
PF: predicated region fallthrough
CT: control target
= control target key end

     0   :  { %9 = vsyncpa [#allocation3], 0  ;;  %s1672_s0 = inlined_call_operand.vmem [shape: f32[4,16,6], index: 0, kind: input, shape index: {}]   ;;  %s1673_s1 = inlined_call_operand.vmem [shape: f32[4,16,4], index: 1, kind: input, shape index: {}]   ;;  %s1674_s2 = inlined_call_operand.vmem [shape: bf16[208,128], index: 2, kind: input, shape index: {}]   ;;  %s1675_s3 = inlined_call_operand.vmem [shape: f32[8,128], index: 3, kind: input, shape index: {}]   ;;  %s1676_s4 = inlined_call_operand.hbm [shape: f32[4,16,128], index: 4, kind: output, shape index: {}]  }
   0x1   :  { %11 = vsyncpa [#allocation3 + $0x1], 0  ;;  %s1338_s15 = smov 0   ;;  %s1340_s16 = smov 0  }
   0x2   :  { %s1342_s17 = smov 0   ;;  %s1344_s18 = smov 0  }
   0x3 LB: > { %s1359_s19 = sadd.s32 4294967295, %s1304_s18   ;;  %s1005_s20 = sadd.s32 4294967294, %s1304_s18   ;;  %s1304_s18 = sphi %s1344_s18, %s1682_s18   ;;  %s1300_s17 = sphi %s1342_s17, %s1681_s17   ;;  %s1296_s16 = sphi %s1340_s16, %s1680_s16   ;;  %s1292_s15 = sphi %s1338_s15, %s1679_s15  }
   0x4   : > { %s1363_s21 = sadd.s32 1, %s1304_s18   ;;  %s118_s22 = sadd.s32 1, %s1300_s17 }
   0x5   : > { %s115_s23 = ssub.s32 %s1304_s18, %s1363_s21  ;;  %p128_p0 = scmp.ne.s32.totalorder %s1300_s17, %s1296_s16 }
   0x6   : > { %p116_p1 = scmp.eq.s32.totalorder %s115_s23, 0  ;;  %p129_p2 = scmp.eq.s32.totalorder %s1359_s19, 1 }
   0x7   : > { %p134_p3 = scmp.ne.s32.totalorder %s1296_s16, %s1292_s15  ;;  %p135_p4 = scmp.eq.s32.totalorder %s1005_s20, 1 }
   0x8   : > { %s1374_s24 = scalar_select %p116_p1, %s1300_s17, %s118_s22  }
   0x9   : > { %p1376_p5 = por %p129_p2, %p128_p0  ;;  %p1380_p6 = por %p135_p4, %p134_p3 }
   0xa   : > { %p1008_p7 = scmp.ge.s32.totalorder %s1304_s18, 1  ;;  %p179_p8 = scmp.lt.s32.totalorder %s1304_s18, 3 }
   0xc   : > { %p180_p9 = pnand %p1008_p7, %p179_p8 }
   0xd   : > { %s1010_s27 = sshll.u32 (!%p180_p9), %s1359_s19, 1  ;;  %s1306_s6 = smov (!%p180_p9), 6  }
   0xe   : > { %183 = sbr.rel (%p180_p9) target bundleno = 1405 (0x57d), region = 36  ;;  %p213_p10 = scmp.lt.s32.totalorder (!%p180_p9), %s1010_s27, 3 }
   0xf   : > { %s1307_s12 = smov (!%p180_p9), 20   ;;  %s1308_s13 = smov (!%p180_p9), 10  }
  0x10   : > { %s1309_s29 = smov (!%p180_p9), 32   ;;  %s1310_s30 = smov (!%p180_p9), 16  }
  0x11   : > { %s209_s8 = sand.u32 (!%p180_p9), 1, %s1296_s16  }
  0x12   : > { %s1009_s9 = sshll.u32 (!%p180_p9), %s209_s8, 5  ;;  %s915_s23 = scalar_lea.sflag (!%p180_p9), [#allocation3], %s209_s8 }
  0x13   : > { %s1684_s27 = smov (!%p213_p10, %s1010_s27), 3  ;;  %v1093_v6 = vld [vmem:[%s1674_s2 + $0x28] sm:$0xff]  ;;  %vm608_vm0 = vcmask 1044480   ;;  %v284_v8 = vlaneseq  ;;  %vm279_vm1 = vcmask 48128   ;;  %vm419_vm5 = vcmask 80896   ;;  %v1088_v53 = vld [vmem:[%s1674_s2] sm:$0xff] }
  0x14   : > { %s1086_s28 = sshll.u32 %s1684_s27, 4  ;;  %v610_v7 = vsel %vm608_vm0, %v1093_v6, 0  ;;  %v1089_v51 = vld [vmem:[%s1674_s2 + $0x8] sm:$0xff]  ;;  %vm450_vm7 = vcmask 1046528   ;;  %vm424_vm9 = vcmask 162816   ;;  %vm443_vm10 = vcmask 244736  }
  0x15   : > { %s224_s5 = scalar_lea.vmem %s1673_s1, %s1086_s28  ;;  %619 = vmatpush.bf16.msra.mxu2 %v610_v7  ;;  %1105 = vmatpush.bf16.msra.mxu3 %v610_v7  ;;  %s217_s11 = scalar_lea.vmem %s1672_s0, %s1086_s28  ;;  %v1396_v9 = vshrl.u32 %v284_v8, 7  ;;  %v452_v52 = vsel %vm450_vm7, %v1089_v51, 0  ;;  %vm538_vm12 = vcmask 261120   ;;  %vm533_vm13 = vcmask 130048  }
  0x16   : > { %v260_v0 = vld [vmem:[%s224_s5 + $0x8] sm:$0xff]  ;;  %v261_v1 = vld [vmem:[%s224_s5 + $0x10] sm:$0xff]  ;;  %v259_v3 = vld [vmem:[%s224_s5] sm:$0xff]  ;;  %1103 = vmatpush.bf16.msra.mxu1 %v452_v52  ;;  %460 = vmatpush.bf16.msra.mxu0 %v452_v52  ;;  %vm564_vm14 = vcmask 392192   ;;  %s211_s10 = scalar_lea.vmem [#allocation2], %s1009_s9 }
  0x17   : > { %v1152_v2 = vpack.i.bf16 %v261_v1, %v260_v0  ;;  %v262_v4 = vld [vmem:[%s224_s5 + $0x18] sm:$0xff]  ;;  %v256_v11 = vld [vmem:[%s217_s11 + $0x8] sm:$0xff]  ;;  %v257_v12 = vld [vmem:[%s217_s11 + $0x10] sm:$0xff]  ;;  %v287_v15 = vadd.s32 16, %v1396_v9  ;;  %vm349_vm2 = vcmp.lt.s32.totalorder %v1396_v9, 2  ;;  %vm370_vm3 = vcmp.lt.s32.totalorder %v1396_v9, 1 }
  0x18   : > { %v1157_v5 = vpack.i.bf16 %v262_v4, %v259_v3  ;;  %v255_v25 = vld [vmem:[%s217_s11] sm:$0xff]  ;;  %v258_v26 = vld [vmem:[%s217_s11 + $0x18] sm:$0xff]  ;;  %v1413_v38 = vand.u32 15, %v1396_v9  ;;  %vm643_vm15 = vcmp.lt.s32.totalorder %v1396_v9, 4  ;;  %v1097_v9 = vld [vmem:[%s1674_s2 + $0x48] sm:$0xff]  ;;  %s1102_s11 = sshll.u32 %s1359_s19, 5 }
  0x19   : > { %1153 = vrot.lane.b32.xlu0 %v1152_v2, %s1306_s6  ;;  %v1402_v20 = vand.u32 15, %v287_v15  ;;  %v1459_v15 = vld [vmem:[%s1675_s3] sm:$0xff]  ;;  %s927_s14 = scalar_lea.hbm %s1676_s4, %s1102_s11  ;;  %s928_s20 = sshll.u32 %s211_s10, 4  ;;  %s929_s20 = int_to_ptr.vmem [resolvable:$true] %s928_s20 }
  0x1a   : > { %vm341_vm6 = vcmp.ge.s32.totalorder %v1413_v38, 1  ;;  %1104 = vmatpush.bf16.msra.mxu1 %v1088_v53  ;;  %461 = vmatpush.bf16.msra.mxu0 %v1088_v53  ;;  %vm337_vm11 = vcmp.ge.s32.totalorder %v1413_v38, 2  ;;  %v1092_v53 = vld [vmem:[%s1674_s2 + $0x20] sm:$0xff]  ;;  %vm635_vm0 = vcmp.ge.s32.totalorder %v1413_v38, 4  ;;  %s930_s22 = sshll.u32 %s927_s14, 4  ;;  %s931_s22 = int_to_ptr.hbm [resolvable:$true] %s930_s22 }
  0x1b   : > { %vm343_vm4 = vcmp.ge.s32.totalorder %v1402_v20, 1  ;;  %vm339_vm8 = vcmp.ge.s32.totalorder %v1402_v20, 2  ;;  %s1256_s27 = sshra.s32 %s931_s22, 4  ;;  %s1257_s27 = int_to_ptr.hbm [resolvable:$true] %s1256_s27 }
  0x1c   : > { %s1258_s28 = scalar_lea.hbm %s1257_s27, 32  ;;  %p1263_p0 = scmp.lt.s32.totalorder %s1257_s27, %s1676_s4 }
  0x1d   : > { %p1259_p11 = scmp.ne.s32.totalorder %s1257_s27, %s1258_s28 }
  0x1e   : > { %576 = vmatpush.bf16.msrb.mxu1 %v1092_v53 }
  0x1f   : > { %p1260_p12 = pnand %p1259_p11, %p1376_p5 }
  0x21   : > { %1158 = vrot.lane.b32.xlu0 %v1157_v5, %s1306_s6  ;;  %p1261_p13 = pneg %p1260_p12  ;;  %s1262_s6 = scalar_lea.hbm %s1676_s4, 64 }
  0x22   : > { %p1264_p1 = scmp.lt.s32.totalorder %s1262_s6, %s1258_s28 }
  0x24   : > { %p1265_p2 = por %p1264_p1, %p1263_p0 }
  0x26   : > { %p1266_p3 = pnand %p1265_p2, %p1261_p13 }
  0x8b   : > { %v1154_v10 = vpop.permute.xlu0 %1153 }
  0x8c   : > { %v1156_v13 = vunpack.i.h.bf16 %v1154_v10  ;;  %v1155_v14 = vunpack.i.l.bf16 %v1154_v10 }
  0x8e   : > { %v281_v16 = vsel %vm279_vm1, %v256_v11, %v1155_v14  ;;  %v282_v17 = vsel %vm279_vm1, %v257_v12, %v1156_v13 }
  0x8f   : > { %v346_v18 = vrot.slane %v281_v16, 6  ;;  %v347_v19 = vrot.slane %v282_v17, 6  ;;  %v367_v22 = vrot.slane %v281_v16, 7  ;;  %v368_v23 = vrot.slane %v282_v17, 7 }
  0x91   : > { %v351_v21 = vsel %vm349_vm2, %v346_v18, %v347_v19  ;;  %v372_v31 = vsel %vm370_vm3, %v367_v22, %v368_v23 }
  0x92   : > { %v385_v44 = vsel %vm343_vm4, %v372_v31, 0.0  ;;  %v364_v60 = vsel %vm339_vm8, %v351_v21, 0.0 }
  0x93   : > { %v1159_v24 = vpop.permute.xlu0 %1158 }
  0x94   : > { %v1161_v27 = vunpack.i.h.bf16 %v1159_v24  ;;  %v1160_v28 = vunpack.i.l.bf16 %v1159_v24 }
  0x96   : > { %v280_v29 = vsel %vm279_vm1, %v255_v25, %v1160_v28  ;;  %v283_v30 = vsel %vm279_vm1, %v258_v26, %v1161_v27  ;;  %vm637_vm1 = vcmp.ge.s32.totalorder %v1402_v20, 4  ;;  %v828_v20 = vperm.slane %v1459_v15, 4 }
  0x97   : > { %v345_v32 = vrot.slane %v280_v29, 6  ;;  %v348_v33 = vrot.slane %v283_v30, 6  ;;  %v1172_v34 = vpack.i.bf16 %v283_v30, %v282_v17  ;;  %v594_v35 = vpack.c.bf16 %v281_v16, %v280_v29 }
  0x98   : > { %v595_v36 = vpack.c.bf16 %v283_v30, %v282_v17  ;;  %v369_v37 = vrot.slane %v283_v30, 7  ;;  %v366_v39 = vrot.slane %v280_v29, 7  ;;  %v1177_v47 = vpack.i.bf16 %v281_v16, %v280_v29 }
  0x99   : > { %1173 = vrot.lane.b32.xlu2 %v1172_v34, %s1307_s12  ;;  %1044 = vmatmul.msk.bf16.vlgmr.msra.gmra.mxu2 %vm419_vm5, %v594_v35  ;;  %v350_v40 = vsel %vm349_vm2, %v347_v19, %v348_v33  ;;  %v352_v41 = vsel %vm349_vm2, %v345_v32, %v346_v18  ;;  %v353_v42 = vsel %vm349_vm2, %v348_v33, %v345_v32  ;;  %v431_v17 = vperm.slane %v1459_v15, 0 }
  0x9a   : > { %1045 = vmatmul.msk.bf16.vlgmr.msra.gmra.mxu3 %vm419_vm5, %v595_v36  ;;  %v371_v43 = vsel %vm370_vm3, %v368_v23, %v369_v37  ;;  %v374_v46 = vsel %vm370_vm3, %v369_v37, %v366_v39  ;;  %v373_v48 = vsel %vm370_vm3, %v366_v39, %v367_v22  ;;  %v362_v8 = vsel %vm337_vm11, %v353_v42, 0.0 }
  0x9b   : > { %v1162_v45 = vpack.i.bf16 %v371_v43, %v385_v44  ;;  %v383_v49 = vsel %vm341_vm6, %v374_v46, 0.0 }
  0x9c   : > { %v1167_v50 = vpack.i.bf16 %v373_v48, %v383_v49 }
  0x9d   : > { %1163 = vrot.lane.b32.xlu1 %v1162_v45, %s1308_s13 }
  0xa1   : > { %1178 = vrot.lane.b32.xlu2 %v1177_v47, %s1307_s12 }
  0xa5   : > { %1168 = vrot.lane.b32.xlu1 %v1167_v50, %s1308_s13 }
  0xf3   : > { %v1174_v54 = vpop.permute.xlu2 %1173 }
  0xf4   : > { %v1176_v58 = vunpack.i.h.bf16 %v1174_v54  ;;  %v1175_v59 = vunpack.i.l.bf16 %v1174_v54  ;;  %v1091_v54 = vld [vmem:[%s1674_s2 + $0x18] sm:$0xff] }
  0xf5   : > { %577 = vmatpush.bf16.msrb.mxu1 %v1091_v54 }
  0xfb   : > { %v1179_v2 = vpop.permute.xlu2 %1178 }
  0xfc   : > { %v1181_v6 = vunpack.i.h.bf16 %v1179_v2  ;;  %v1180_v7 = vunpack.i.l.bf16 %v1179_v2 }
 0x10f   : > { %v1164_v55 = vpop.permute.xlu1 %1163 }
 0x110   : > { %v1166_v56 = vunpack.i.h.bf16 %v1164_v55  ;;  %v1165_v57 = vunpack.i.l.bf16 %v1164_v55  ;;  %v1090_v55 = vld [vmem:[%s1674_s2 + $0x10] sm:$0xff] }
 0x111   : > { %578 = vmatpush.bf16.msrb.mxu1 %v1090_v55 }
 0x112   : > { %v423_v61 = vsel %vm419_vm5, %v350_v40, %v1166_v56  ;;  %v422_v62 = vsel %vm419_vm5, %v364_v60, %v1165_v57 }
 0x113   : > { %v427_v63 = vsel %vm424_vm9, %v422_v62, %v1175_v59  ;;  %v428_v0 = vsel %vm424_vm9, %v423_v61, %v1176_v58 }
 0x114   : > { %v430_v1 = vpack.c.bf16 %v428_v0, %v427_v63 }
 0x116   : > { %1025 = vmatmul.msk.bf16.vlgmr.msra.gmra.mxu1 %vm443_vm10, %v430_v1 }
 0x117   : > { %v1169_v3 = vpop.permute.xlu1 %1168 }
 0x118   : > { %v1171_v4 = vunpack.i.h.bf16 %v1169_v3  ;;  %v1170_v5 = vunpack.i.l.bf16 %v1169_v3 }
 0x11a   : > { %v420_v10 = vsel %vm419_vm5, %v362_v8, %v1170_v5  ;;  %v421_v11 = vsel %vm419_vm5, %v352_v41, %v1171_v4 }
 0x11b   : > { %v425_v12 = vsel %vm424_vm9, %v420_v10, %v1180_v7  ;;  %v426_v13 = vsel %vm424_vm9, %v421_v11, %v1181_v6 }
 0x11c   : > { %v429_v14 = vpack.c.bf16 %v426_v13, %v425_v12 }
 0x11e   : > { %1024 = vmatmul.msk.bf16.vlgmr.msra.gmra.mxu0 %vm443_vm10, %v429_v14 }
 0x193   : > { %v468_v16 = vpop.f32.mrf.mxu1 }
 0x194   : > { %v469_v18 = vadd.f32 %v468_v16, %v431_v17 }
 0x196   : > { %v475_v22 = vmax.f32 %v469_v18, 0.0  ;;  %v621_v18 = vpop.f32.mrf.mxu2 }
 0x198   : > { %v479_v27 = vrot.slane %v475_v22, 6  ;;  %v491_v39 = vrot.slane %v475_v22, 7 }
 0x19b   : > { %v463_v19 = vpop.f32.mrf.mxu0  ;;  %v470_v21 = vpop.f32.mrf.mxu1 }
 0x19c   : > { %v464_v23 = vadd.f32 %v463_v19, %v431_v17  ;;  %v471_v24 = vadd.f32 %v470_v21, %v431_v17  ;;  %v545_v21 = vperm.slane %v1459_v15, 1 }
 0x19e   : > { %v473_v25 = vmax.f32 %v464_v23, 0.0  ;;  %v476_v26 = vmax.f32 %v471_v24, 0.0  ;;  %v596_v23 = vperm.slane %v1459_v15, 2  ;;  %v623_v24 = vpop.f32.mrf.mxu2 }
 0x1a0   : > { %v477_v28 = vrot.slane %v473_v25, 6  ;;  %v480_v29 = vrot.slane %v476_v26, 6  ;;  %v489_v30 = vrot.slane %v473_v25, 7  ;;  %v492_v31 = vrot.slane %v476_v26, 7 }
 0x1a1   : > { %v1197_v52 = vpack.i.bf16 %v476_v26, %v475_v22 }
 0x1a2   : > { %v481_v32 = vsel %vm349_vm2, %v479_v27, %v480_v29  ;;  %v484_v33 = vsel %vm349_vm2, %v480_v29, %v477_v28  ;;  %v496_v37 = vsel %vm370_vm3, %v492_v31, %v489_v30  ;;  %v493_v49 = vsel %vm370_vm3, %v491_v39, %v492_v31 }
 0x1a3   : > { %v465_v34 = vpop.f32.mrf.mxu0  ;;  %v497_v43 = vsel %vm341_vm6, %v496_v37, 0.0  ;;  %v485_v62 = vsel %vm337_vm11, %v484_v33, 0.0  ;;  %v624_v29 = vadd.f32 %v623_v24, %v596_v23  ;;  %v626_v33 = vpop.f32.mrf.mxu3 }
 0x1a4   : > { %v466_v35 = vadd.f32 %v465_v34, %v431_v17 }
 0x1a6   : > { %v474_v36 = vmax.f32 %v466_v35, 0.0 }
 0x1a8   : > { %v478_v40 = vrot.slane %v474_v36, 6  ;;  %v490_v41 = vrot.slane %v474_v36, 7  ;;  %v1187_v42 = vpack.i.bf16 %v474_v36, %v473_v25 }
 0x1aa   : > { %1188 = vrot.lane.b32.xlu1 %v1187_v42, %s1309_s29  ;;  %v495_v44 = vsel %vm370_vm3, %v489_v30, %v490_v41  ;;  %v494_v45 = vsel %vm370_vm3, %v490_v41, %v491_v39  ;;  %v482_v46 = vsel %vm349_vm2, %v478_v40, %v479_v27  ;;  %v483_v47 = vsel %vm349_vm2, %v477_v28, %v478_v40 }
 0x1ab   : > { %v1182_v48 = vpack.i.bf16 %v495_v44, %v497_v43  ;;  %v499_v50 = vsel %vm343_vm4, %v494_v45, 0.0  ;;  %v487_v8 = vsel %vm339_vm8, %v482_v46, 0.0  ;;  %v622_v28 = vadd.f32 %v621_v18, %v596_v23  ;;  %v628_v41 = vpop.f32.mrf.mxu3 }
 0x1ac   : > { %v1192_v51 = vpack.i.bf16 %v493_v49, %v499_v50  ;;  %v627_v39 = vadd.f32 %v626_v33, %v596_v23  ;;  %v629_v45 = vadd.f32 %v628_v41, %v596_v23 }
 0x1ad   : > { %1183 = vrot.lane.b32.xlu0 %v1182_v48, %s1310_s30 }
 0x1ae   : > { %1193 = vrot.lane.b32.xlu2 %v1192_v51, %s1310_s30 }
 0x1b5   : > { %1198 = vrot.lane.b32.xlu0 %v1197_v52, %s1309_s29 }
 0x208   : > { %v1194_v63 = vpop.permute.xlu2 %1193 }
 0x209   : > { %v1196_v5 = vunpack.i.h.bf16 %v1194_v63  ;;  %v1195_v6 = vunpack.i.l.bf16 %v1194_v63 }
 0x20b   : > { %v537_v12 = vsel %vm533_vm13, %v481_v32, %v1196_v5  ;;  %v536_v13 = vsel %vm533_vm13, %v487_v8, %v1195_v6 }
 0x21c   : > { %v1189_v56 = vpop.permute.xlu1 %1188 }
 0x21d   : > { %v1191_v60 = vunpack.i.h.bf16 %v1189_v56  ;;  %v1190_v61 = vunpack.i.l.bf16 %v1189_v56 }
 0x21f   : > { %v1184_v57 = vpop.permute.xlu0 %1183 }
 0x220   : > { %v1186_v58 = vunpack.i.h.bf16 %v1184_v57  ;;  %v1185_v59 = vunpack.i.l.bf16 %v1184_v57 }
 0x222   : > { %v534_v0 = vsel %vm533_vm13, %v485_v62, %v1185_v59  ;;  %v535_v1 = vsel %vm533_vm13, %v483_v47, %v1186_v58  ;;  %v1094_v62 = vld [vmem:[%s1674_s2 + $0x30] sm:$0xff] }
 0x223   : > { %v539_v2 = vsel %vm538_vm12, %v534_v0, %v1190_v61  ;;  %v540_v3 = vsel %vm538_vm12, %v535_v1, %v1191_v60  ;;  %v1096_v60 = vld [vmem:[%s1674_s2 + $0x40] sm:$0xff]  ;;  %v1095_v61 = vld [vmem:[%s1674_s2 + $0x38] sm:$0xff] }
 0x224   : > { %v543_v4 = vpack.c.bf16 %v540_v3, %v539_v2  ;;  %744 = vmatpush.bf16.msrb.mxu3 %v1096_v60 }
 0x226   : > { %1038 = vmatmul.msk.bf16.vlgmr.msrb.gmra.mxu1 %vm564_vm14, %v543_v4 }
 0x227   : > { %v1199_v7 = vpop.permute.xlu0 %1198 }
 0x228   : > { %v1201_v10 = vunpack.i.h.bf16 %v1199_v7  ;;  %v1200_v11 = vunpack.i.l.bf16 %v1199_v7  ;;  %745 = vmatpush.bf16.msrb.mxu3 %v1095_v61 }
 0x22a   : > { %v541_v14 = vsel %vm538_vm12, %v536_v13, %v1200_v11  ;;  %v542_v16 = vsel %vm538_vm12, %v537_v12, %v1201_v10 }
 0x22b   : > { %v544_v17 = vpack.c.bf16 %v542_v16, %v541_v14 }
 0x22c   : > { %746 = vmatpush.bf16.msrb.mxu3 %v1094_v62 }
 0x236   : > { %1039 = vmatmul.msk.bf16.gmra.mxu1 %vm564_vm14, %v544_v17 }
 0x2a3   : > { %v580_v19 = vpop.f32.mrf.mxu1 }
 0x2a4   : > { %v581_v22 = vadd.f32 %v580_v19, %v545_v21 }
 0x2a6   : > { %v590_v26 = vmax.f32 %v581_v22, 0.0 }
 0x2a8   : > { %v1511_v31 = vadd.f32 %v622_v28, %v590_v26 }
 0x2aa   : > { %v660_v51 = vrot.slane %v1511_v31, 6  ;;  %v639_v0 = vrot.slane %v1511_v31, 4 }
 0x2ab   : > { %v582_v25 = vpop.f32.mrf.mxu1 }
 0x2ac   : > { %v583_v27 = vadd.f32 %v582_v25, %v545_v21 }
 0x2ae   : > { %v591_v30 = vmax.f32 %v583_v27, 0.0 }
 0x2b0   : > { %v1513_v32 = vadd.f32 %v624_v29, %v591_v30 }
 0x2b2   : > { %v1207_v34 = vpack.i.bf16 %v1513_v32, %v1511_v31  ;;  %v661_v47 = vrot.slane %v1513_v32, 6  ;;  %v640_v1 = vrot.slane %v1513_v32, 4 }
 0x2b3   : > { %v585_v35 = vpop.f32.mrf.mxu1 }
 0x2b4   : > { %v586_v36 = vadd.f32 %v585_v35, %v545_v21  ;;  %1208 = vrot.lane.b32.xlu2 %v1207_v34, %s1309_s29  ;;  %v666_v56 = vsel %vm349_vm2, %v660_v51, %v661_v47  ;;  %v646_v10 = vsel %vm643_vm15, %v639_v0, %v640_v1 }
 0x2b6   : > { %v592_v37 = vmax.f32 %v586_v36, 0.0 }
 0x2b8   : > { %v1518_v40 = vadd.f32 %v627_v39, %v592_v37  ;;  %v714_v37 = vperm.slane %v1459_v15, 3 }
 0x2ba   : > { %v662_v44 = vrot.slane %v1518_v40, 6  ;;  %v641_v18 = vrot.slane %v1518_v40, 4 }
 0x2bb   : > { %v587_v42 = vpop.f32.mrf.mxu1 }
 0x2bc   : > { %v588_v43 = vadd.f32 %v587_v42, %v545_v21  ;;  %v665_v49 = vsel %vm349_vm2, %v661_v47, %v662_v44  ;;  %v645_v24 = vsel %vm643_vm15, %v640_v1, %v641_v18 }
 0x2bd   : > { %v670_v53 = vsel %vm339_vm8, %v665_v49, 0.0  ;;  %v658_v28 = vsel %vm637_vm1, %v645_v24, 0.0 }
 0x2be   : > { %v593_v46 = vmax.f32 %v588_v43, 0.0 }
 0x2c0   : > { %v1522_v48 = vadd.f32 %v629_v45, %v593_v46  ;;  %v1099_v45 = vld [vmem:[%s1674_s2 + $0x58] sm:$0xff] }
 0x2c1   : > { %858 = vmatpush.bf16.msrb.mxu2 %v1099_v45 }
 0x2c2   : > { %v663_v50 = vrot.slane %v1522_v48, 6  ;;  %v1217_v59 = vpack.i.bf16 %v1522_v48, %v1518_v40  ;;  %v642_v63 = vrot.slane %v1522_v48, 4 }
 0x2c4   : > { %v664_v52 = vsel %vm349_vm2, %v662_v44, %v663_v50  ;;  %v667_v54 = vsel %vm349_vm2, %v663_v50, %v660_v51  ;;  %v647_v3 = vsel %vm643_vm15, %v642_v63, %v639_v0  ;;  %v644_v27 = vsel %vm643_vm15, %v641_v18, %v642_v63 }
 0x2c5   : > { %v1212_v55 = vpack.i.bf16 %v664_v52, %v670_v53  ;;  %v668_v57 = vsel %vm337_vm11, %v667_v54, 0.0  ;;  %v656_v11 = vsel %vm635_vm0, %v647_v3, 0.0 }
 0x2c6   : > { %v1202_v58 = vpack.i.bf16 %v666_v56, %v668_v57 }
 0x2c7   : > { %1213 = vrot.lane.b32.xlu0 %v1212_v55, %s1310_s30 }
 0x2c8   : > { %1203 = vrot.lane.b32.xlu1 %v1202_v58, %s1310_s30 }
 0x2d0   : > { %1218 = vrot.lane.b32.xlu1 %v1217_v59, %s1309_s29 }
 0x30e   : > { %v1209_v2 = vpop.permute.xlu2 %1208 }
 0x30f   : > { %v1211_v7 = vunpack.i.h.bf16 %v1209_v2  ;;  %v1210_v8 = vunpack.i.l.bf16 %v1209_v2 }
 0x339   : > { %v1214_v19 = vpop.permute.xlu0 %1213 }
 0x33a   : > { %v1204_v4 = vpop.permute.xlu1 %1203  ;;  %v1216_v22 = vunpack.i.h.bf16 %v1214_v19  ;;  %v1215_v23 = vunpack.i.l.bf16 %v1214_v19 }
 0x33b   : > { %v1206_v5 = vunpack.i.h.bf16 %v1204_v4  ;;  %v1205_v6 = vunpack.i.l.bf16 %v1204_v4 }
 0x33c   : > { %v707_v29 = vsel %vm533_vm13, %v644_v27, %v1216_v22  ;;  %v706_v30 = vsel %vm533_vm13, %v658_v28, %v1215_v23 }
 0x33d   : > { %v704_v12 = vsel %vm533_vm13, %v656_v11, %v1205_v6  ;;  %v705_v13 = vsel %vm533_vm13, %v646_v10, %v1206_v5 }
 0x33e   : > { %v708_v14 = vsel %vm538_vm12, %v704_v12, %v1210_v8  ;;  %v709_v16 = vsel %vm538_vm12, %v705_v13, %v1211_v7  ;;  %v1098_v12 = vld [vmem:[%s1674_s2 + $0x50] sm:$0xff] }
 0x33f   : > { %v712_v17 = vpack.c.bf16 %v709_v16, %v708_v14  ;;  %859 = vmatpush.bf16.msrb.mxu2 %v1098_v12 }
 0x341   : > { %1058 = vmatmul.msk.bf16.vlgmr.msrb.gmra.mxu3 %vm564_vm14, %v712_v17 }
 0x342   : > { %v1219_v21 = vpop.permute.xlu1 %1218 }
 0x343   : > { %v1221_v25 = vunpack.i.h.bf16 %v1219_v21  ;;  %v1220_v26 = vunpack.i.l.bf16 %v1219_v21  ;;  %860 = vmatpush.bf16.msrb.mxu2 %v1097_v9 }
 0x345   : > { %v710_v33 = vsel %vm538_vm12, %v706_v30, %v1220_v26  ;;  %v711_v34 = vsel %vm538_vm12, %v707_v29, %v1221_v25 }
 0x346   : > { %v713_v35 = vpack.c.bf16 %v711_v34, %v710_v33 }
 0x351   : > { %1059 = vmatmul.msk.bf16.gmra.mxu3 %vm564_vm14, %v713_v35 }
 0x3c4   : > { %v748_v36 = vpop.f32.mrf.mxu3 }
 0x3c5   : > { %v749_v39 = vadd.f32 %v748_v36, %v714_v37 }
 0x3c7   : > { %v758_v42 = vmax.f32 %v749_v39, 0.0 }
 0x3c9   : > { %v762_v46 = vrot.slane %v758_v42, 4  ;;  %v774_v62 = vrot.slane %v758_v42, 6 }
 0x3cc   : > { %v750_v41 = vpop.f32.mrf.mxu3 }
 0x3cd   : > { %v751_v43 = vadd.f32 %v750_v41, %v714_v37 }
 0x3cf   : > { %v759_v44 = vmax.f32 %v751_v43, 0.0 }
 0x3d1   : > { %v763_v47 = vrot.slane %v759_v44, 4  ;;  %v1227_v49 = vpack.i.bf16 %v759_v44, %v758_v42  ;;  %v775_v58 = vrot.slane %v759_v44, 6  ;;  %v1100_v42 = vld [vmem:[%s1674_s2 + $0x60] sm:$0xff] }
 0x3d2   : > { %898 = vmatpush.bf16.msrb.mxu0 %v1100_v42 }
 0x3d3   : > { %1228 = vrot.lane.b32.xlu0 %v1227_v49, %s1309_s29  ;;  %v768_v50 = vsel %vm643_vm15, %v762_v46, %v763_v47  ;;  %v780_v7 = vsel %vm349_vm2, %v774_v62, %v775_v58 }
 0x3d4   : > { %v753_v51 = vpop.f32.mrf.mxu3 }
 0x3d5   : > { %v754_v52 = vadd.f32 %v753_v51, %v714_v37 }
 0x3d7   : > { %v760_v53 = vmax.f32 %v754_v52, 0.0 }
 0x3d9   : > { %v764_v54 = vrot.slane %v760_v53, 4  ;;  %v776_v55 = vrot.slane %v760_v53, 6 }
 0x3db   : > { %v767_v56 = vsel %vm643_vm15, %v763_v47, %v764_v54  ;;  %v779_v61 = vsel %vm349_vm2, %v775_v58, %v776_v55 }
 0x3dc   : > { %v755_v57 = vpop.f32.mrf.mxu3  ;;  %v784_v1 = vsel %vm339_vm8, %v779_v61, 0.0  ;;  %v772_v34 = vsel %vm637_vm1, %v767_v56, 0.0 }
 0x3dd   : > { %v756_v59 = vadd.f32 %v755_v57, %v714_v37 }
 0x3df   : > { %v761_v60 = vmax.f32 %v756_v59, 0.0 }
 0x3e1   : > { %v765_v63 = vrot.slane %v761_v60, 4  ;;  %v777_v0 = vrot.slane %v761_v60, 6  ;;  %v1237_v11 = vpack.i.bf16 %v761_v60, %v760_v53 }
 0x3e3   : > { %v778_v2 = vsel %vm349_vm2, %v776_v55, %v777_v0  ;;  %v781_v3 = vsel %vm349_vm2, %v777_v0, %v774_v62  ;;  %v769_v4 = vsel %vm643_vm15, %v765_v63, %v762_v46  ;;  %v766_v5 = vsel %vm643_vm15, %v764_v54, %v765_v63 }
 0x3e4   : > { %v1232_v6 = vpack.i.bf16 %v778_v2, %v784_v1  ;;  %v782_v8 = vsel %vm337_vm11, %v781_v3, 0.0  ;;  %v770_v18 = vsel %vm635_vm0, %v769_v4, 0.0 }
 0x3e5   : > { %v1222_v10 = vpack.i.bf16 %v780_v7, %v782_v8 }
 0x3e6   : > { %1233 = vrot.lane.b32.xlu1 %v1232_v6, %s1310_s30 }
 0x3e7   : > { %1223 = vrot.lane.b32.xlu2 %v1222_v10, %s1310_s30 }
 0x3ef   : > { %1238 = vrot.lane.b32.xlu2 %v1237_v11, %s1309_s29 }
 0x441   : > { %v1224_v13 = vpop.permute.xlu2 %1223 }
 0x442   : > { %v1226_v14 = vunpack.i.h.bf16 %v1224_v13  ;;  %v1225_v16 = vunpack.i.l.bf16 %v1224_v13 }
 0x444   : > { %v818_v22 = vsel %vm533_vm13, %v770_v18, %v1225_v16  ;;  %v819_v23 = vsel %vm533_vm13, %v768_v50, %v1226_v14 }
 0x445   : > { %v1229_v17 = vpop.permute.xlu0 %1228 }
 0x446   : > { %v1231_v19 = vunpack.i.h.bf16 %v1229_v17  ;;  %v1230_v21 = vunpack.i.l.bf16 %v1229_v17 }
 0x448   : > { %v822_v24 = vsel %vm538_vm12, %v818_v22, %v1230_v21  ;;  %v823_v25 = vsel %vm538_vm12, %v819_v23, %v1231_v19 }
 0x449   : > { %v826_v26 = vpack.c.bf16 %v823_v25, %v822_v24  ;;  %v1239_v27 = vpop.permute.xlu2 %1238 }
 0x44a   : > { %v1241_v33 = vunpack.i.h.bf16 %v1239_v27  ;;  %v1240_v38 = vunpack.i.l.bf16 %v1239_v27 }
 0x44b   : > { %1072 = vmatmul.msk.bf16.vlgmr.msrb.gmra.mxu2 %vm564_vm14, %v826_v26 }
 0x458   : > { %v1234_v28 = vpop.permute.xlu1 %1233 }
 0x459   : > { %v1236_v29 = vunpack.i.h.bf16 %v1234_v28  ;;  %v1235_v30 = vunpack.i.l.bf16 %v1234_v28 }
 0x45b   : > { %v821_v35 = vsel %vm533_vm13, %v766_v5, %v1236_v29  ;;  %v820_v36 = vsel %vm533_vm13, %v772_v34, %v1235_v30 }
 0x45c   : > { %v824_v37 = vsel %vm538_vm12, %v820_v36, %v1240_v38  ;;  %v825_v39 = vsel %vm538_vm12, %v821_v35, %v1241_v33 }
 0x45d   : > { %v827_v41 = vpack.c.bf16 %v825_v39, %v824_v37 }
 0x45f   : > { %1073 = vmatmul.msk.bf16.gmra.mxu2 %vm564_vm14, %v827_v41 }
 0x4ce   : > { %v862_v43 = vpop.f32.mrf.mxu2 }
 0x4cf   : > { %v863_v44 = vadd.f32 %v862_v43, %v828_v20 }
 0x4d1   : > { %v872_v47 = vadd.f32 %v863_v44, %v1511_v31  ;;  %v878_v31 = vperm.slane %v1459_v15, 5 }
 0x4d6   : > { %v864_v45 = vpop.f32.mrf.mxu2 }
 0x4d7   : > { %v865_v46 = vadd.f32 %v864_v45, %v828_v20 }
 0x4d9   : > { %v873_v49 = vadd.f32 %v865_v46, %v1513_v32 }
 0x4db   : > { %v876_v50 = vpack.c.bf16 %v873_v49, %v872_v47 }
 0x4dd   : > { %1078 = vmatmul.msk.bf16.vlgmr.msrb.gmra.mxu0 %vm533_vm13, %v876_v50 }
 0x4e2   : > { %v867_v51 = vpop.f32.mrf.mxu2 }
 0x4e3   : > { %v868_v52 = vadd.f32 %v867_v51, %v828_v20 }
 0x4e5   : > { %v874_v55 = vadd.f32 %v868_v52, %v1518_v40 }
 0x4ea   : > { %v869_v53 = vpop.f32.mrf.mxu2 }
 0x4eb   : > { %v870_v54 = vadd.f32 %v869_v53, %v828_v20 }
 0x4ed   : > { %v875_v56 = vadd.f32 %v870_v54, %v1522_v48 }
 0x4ef   : > { %v877_v57 = vpack.c.bf16 %v875_v56, %v874_v55 }
 0x4f1   : > { %1079 = vmatmul.msk.bf16.gmra.mxu0 %vm533_vm13, %v877_v57 }
 0x55a   : > { %v900_v32 = vpop.f32.mrf.mxu0 }
 0x55b   : > { %v901_v58 = vadd.f32 %v900_v32, %v878_v31 }
 0x55d   : > { %910 = vst [vmem:[%s211_s10] sm:$0xff] %v901_v58 }
 0x562   : > { %v902_v59 = vpop.f32.mrf.mxu0 }
 0x563   : > { %v903_v60 = vadd.f32 %v902_v59, %v878_v31 }
 0x565   : > { %911 = vst [vmem:[%s211_s10 + $0x8] sm:$0xff] %v903_v60 }
 0x56e   : > { %v905_v61 = vpop.f32.mrf.mxu0 }
 0x56f   : > { %v906_v40 = vadd.f32 %v905_v61, %v878_v31 }
 0x571   : > { %912 = vst [vmem:[%s211_s10 + $0x10] sm:$0xff] %v906_v40 }
 0x576   : > { %v907_v15 = vpop.f32.mrf.mxu0 }
 0x577   : > { %v908_v48 = vadd.f32 %v907_v15, %v878_v31 }
 0x579   : > { %913 = vst [vmem:[%s211_s10 + $0x18] sm:$0xff] %v908_v48 }
 0x57a   : > { %1269 = shalt.err (!%p1266_p3)
}
 0x57b   : > { %s1311_s30 = smov 128   ;;  %s1312_s8 = smov 8  }
 0x57c   : > { %1106 = dma.vmem_to_hbm [thread:$0]  (%p1376_p5), %s929_s20, 512, %s931_s22, %s915_s23, %s1311_s30, %s1311_s30, %s1312_s8  }
 0x57d PF: > { %p1112_p4 = scmp.ge.s32.totalorder %s1304_s18, 2  ;;  %s945_s9 = sand.u32 1, %s1292_s15  }
 0x57e   : > { %s946_s10 = scalar_lea.sflag [#allocation3], %s945_s9 }
 0x57f   : > { %p1109_p7 = pnand %p1112_p4, %p1380_p6 }
 0x581   : > { %p1110_p8 = pneg %p1109_p7 }
 0x583   : > { %1287 = dma.done.wait (%p1110_p8), %s946_s10, 512  }
 0x584   : > { %1289 = vsyncadd (%p1110_p8), %s946_s10, 4294966784  ;;  %p14_p9 = scmp.ge.s32.totalorder %s1363_s21, 4   ;;  %s1679_s15 = smov %s1296_s16 }
 0x585   : > { %s1680_s16 = smov %s1300_s17  ;;  %s1681_s17 = smov %s1374_s24 }
 0x586   : > { %s1682_s18 = smov %s1363_s21  ;;  %16 = sbr.rel (!%p14_p9) target bundleno = 3 (0x3), region = 74 }
 0x58b   :  { %952 = vsyncpa [#allocation3], 1 }
 0x58c   :  { %954 = vsyncpa [#allocation3 + $0x1], 1 }

</bundles_post_ra>
